<compile_context>
chip_gen: v7x
topology: tpu7x:2x2x1
jax: 0.10.0
libtpu: 0.0.40
codegen_flags: <defaults>
</compile_context>

<pallas_src>
import functools
import math

import jax
import jax.numpy as jnp
from jax.experimental import pallas as pl
from jax.experimental.pallas import tpu as pltpu


# ----------------------------- Pallas kernel -------------------------------- #

def _baseline_kernel(x_ref, denom_ref, w_ref, b_ref, out_ref, *,
                     zero_sum: bool, reward_min: float, reward_max: float):
    """Fused spatial pool + per-row linear head + activation + reward rescale.

    x_ref:     (TB, 2, C, S)  input features (any float dtype; f32 accumulation)
    denom_ref: (TB, 2)        spatial-mask sum (or H*W when rescale_input=False)
    w_ref:     (TB, 2, C)     per-row gathered head weights
    b_ref:     (TB, 2)        per-row gathered head biases
    out_ref:   (TB, 2)        rescaled value prediction per (game, player)
    """
    # Per-player pooling + weighted channel reduction (3-D math, static 2-loop).
    vs = []
    for pidx in range(2):
        xp = x_ref[:, pidx, :, :].astype(jnp.float32)          # (TB, C, S)
        pooled = jnp.sum(xp, axis=-1)                          # (TB, C)  XLU reduce
        wsum = jnp.sum(pooled * w_ref[:, pidx, :],
                       axis=-1, keepdims=True)                 # (TB, 1)
        vs.append(wsum)
    v = jnp.concatenate(vs, axis=-1)                           # (TB, 2)

    # Reassociated normalisation: one reciprocal per row on the EUP instead of
    # a (TB, 2, C) broadcast divide on the VPU.  Mathematically identical.
    v = v * pl.reciprocal(denom_ref[...], approx=True) + b_ref[...]

    if zero_sum:
        # Pairwise (2-player) softmax, max-stabilised.
        m = jnp.max(v, axis=-1, keepdims=True)
        e = jnp.exp(v - m)
        p = e / jnp.sum(e, axis=-1, keepdims=True)
    else:
        p = jax.nn.sigmoid(v)

    out_ref[...] = p * (reward_max - reward_min) + reward_min


# ------------------------------ Python wrapper ------------------------------ #

def _choose_game_tile(b, c, s, itemsize, per_buffer_budget=4 * 1024 * 1024):
    """Largest game-axis tile whose x-block fits the per-buffer VMEM budget.

    Keeps 2 (double-buffer) x-blocks well under v5e's 16 MiB default scoped
    VMEM and v7x's 64 MiB physical VMEM.  Requires TB == b, or TB a multiple of
    8 (block layout) that divides b (no ragged tiles).
    """
    bytes_per_game = 2 * c * s * itemsize
    max_tb = max(1, per_buffer_budget // bytes_per_game)
    if max_tb >= b:
        return b
    tb = (max_tb // 8) * 8
    while tb >= 8:
        if b % tb == 0:
            return tb
        tb -= 8
    return b  # fall back to a single tile for awkward batch sizes


def baseline_layer_forward(
    x,                     # (B, C, H, W)  == (b*2, n_channels, x, y)
    input_mask,            # (B, 1, H, W)
    value_head_idxs,       # (B, 1) int32 or None
    params,                # dict: "weights" (n_heads, C, 1), "biases" (n_heads, 1)
    *,
    rescale_input: bool,
    multi_headed: bool,
    zero_sum: bool,
    reward_min: float,
    reward_max: float,
    only_once: bool,
    max_days: int = 360,
):
    B, C, H, W = x.shape
    assert B % 2 == 0, "expects b*2 rows (player axis folded into batch)"
    b = B // 2
    S = H * W

    rmin, rmax = float(reward_min), float(reward_max)
    if not only_once:
        rmin *= max_days
        rmax *= max_days

    # (b, 2, C, S): game axis on the grid, player pair inside each block.
    # dtype is preserved; a bf16 x halves HBM traffic (kernel accumulates f32).
    x4 = x.reshape(b, 2, C, S)

    # Pre-reduce the spatial mask to a per-row denominator so the kernel never
    # streams a (B, 1, S) mask (nor a materialised all-ones tensor).
    if rescale_input:
        denom = input_mask.reshape(b, 2, S).astype(jnp.float32).sum(axis=-1)
        denom = jnp.maximum(denom, 1e-6)   # guard all-masked rows (NaN otherwise)
    else:
        denom = jnp.full((b, 2), float(S), jnp.float32)   # mean == sum / (H*W)

    # Glue: gather per-row head weights/biases (MultiLinear's weights[idxs]).
    # This is (b,2,C) — tiny next to x — so a wrapper-side gather is fine; a
    # scalar-prefetch index_map gather only pays off for very large b.
    if multi_headed:
        idxs = value_head_idxs.reshape(b, 2)
        w_sel = params["weights"][idxs, :, 0]              # (b, 2, C)
        b_sel = params["biases"][idxs, 0]                  # (b, 2)
    else:
        w_sel = jnp.broadcast_to(params["weights"][0, :, 0], (b, 2, C))
        b_sel = jnp.broadcast_to(params["biases"][0, 0], (b, 2))
    w_sel = w_sel.astype(jnp.float32)
    b_sel = b_sel.astype(jnp.float32)

    tb = _choose_game_tile(b, C, S, x4.dtype.itemsize)

    kernel = functools.partial(
        _baseline_kernel, zero_sum=zero_sum, reward_min=rmin, reward_max=rmax)

    out = pl.pallas_call(
        kernel,
        out_shape=jax.ShapeDtypeStruct((b, 2), jnp.float32),
        grid=(b // tb,),
        in_specs=[
            pl.BlockSpec((tb, 2, C, S), lambda i: (i, 0, 0, 0)),
            pl.BlockSpec((tb, 2), lambda i: (i, 0)),
            pl.BlockSpec((tb, 2, C), lambda i: (i, 0, 0)),
            pl.BlockSpec((tb, 2), lambda i: (i, 0)),
        ],
        out_specs=pl.BlockSpec((tb, 2), lambda i: (i, 0)),
        compiler_params=pltpu.CompilerParams(
            dimension_semantics=("parallel",)),   # megacore sharding on v7x
    )(x4, denom, w_sel, b_sel)
    return out


# --------------------------------- main ------------------------------------- #

if __name__ == "__main__":
    # Config (synthetic RewardSpec): zero_sum=True, only_once=False,
    # reward_min=0, reward_max=1, MAX_DAYS=360; n_value_heads=3; rescale_input=True.
    b = 2                      # number of games -> B = b*2 rows
    B = b * 2
    C = 32                     # in_channels
    H = W = 16
    n_heads = 3
    reward_min, reward_max = 0.0, 1.0
    zero_sum = True
    only_once = False
    max_days = 360
    rescale_input = True
    multi_headed = n_heads > 1

    key = jax.random.PRNGKey(0)
    kx, km, kw, kb, ki = jax.random.split(key, 5)

    x = jax.random.normal(kx, (B, C, H, W), jnp.float32)
    # Binary spatial mask (never all-zero per row).
    col = jax.lax.broadcasted_iota(jnp.int32, (B, 1, H, W), 3)
    input_mask = (col < 12).astype(jnp.float32)
    value_head_idxs = jax.random.randint(ki, (B, 1), 0, n_heads, jnp.int32)

    # Deterministic Kaiming-style init (MultiLinear.reset_parameters):
    # fan_in = in_features * out_features = C -> bound = 1/sqrt(C).
    bound = 1.0 / math.sqrt(C)
    params = {
        "weights": jax.random.uniform(kw, (n_heads, C, 1), jnp.float32, -bound, bound),
        "biases": jax.random.uniform(kb, (n_heads, 1), jnp.float32, -bound, bound),
    }

    out = baseline_layer_forward(
        x, input_mask, value_head_idxs, params,
        rescale_input=rescale_input, multi_headed=multi_headed, zero_sum=zero_sum,
        reward_min=reward_min, reward_max=reward_max, only_once=only_once,
        max_days=max_days,
    )
    out = jax.block_until_ready(out)

    # Pure-JAX reference check.
    xs = x.reshape(B, C, -1).sum(-1) / input_mask.reshape(B, 1, -1).sum(-1)
    idxs = value_head_idxs.reshape(-1)
    v_ref = (xs * params["weights"][idxs, :, 0]).sum(-1, keepdims=True) + params["biases"][idxs]
    v_ref = v_ref.reshape(-1, 2)
    p_ref = jax.nn.softmax(v_ref, axis=-1)
    rmin_s, rmax_s = reward_min * max_days, reward_max * max_days
    ref = p_ref * (rmax_s - rmin_s) + rmin_s

    assert out.shape == (b, 2)
    # atol is loose enough to absorb the approximate EUP reciprocal on the
    # pooling denominator (output range is [0, 360]; real bugs show up as
    # multi-unit deviations), tight enough to catch pairing/head/mask errors.
    assert jnp.allclose(out, ref, atol=1e-1, rtol=1e-3), (out, ref)
    print("KERNEL_OK")
</pallas_src>

<mosaic_0001>
module attributes {stable_mosaic.version = 11 : i64} {
  func.func @_baseline_kernel(%arg0: i32, %arg1: memref<2x2x32x256xf32, #tpu.memory_space<vmem>>, %arg2: memref<2x2xf32, #tpu.memory_space<vmem>>, %arg3: memref<2x2x32xf32, #tpu.memory_space<vmem>>, %arg4: memref<2x2xf32, #tpu.memory_space<vmem>>, %arg5: memref<2x2xf32, #tpu.memory_space<vmem>>) attributes {dimension_semantics = [#tpu.dimension_semantics<parallel>], iteration_bounds = array<i64: 1>, scalar_prefetch = 0 : i64, scratch_operands = 0 : i64, tpu.core_type = #tpu.core_type<tc>, window_params = [{transform_indices = @transform_0, window_bounds = array<i64: 2, 2, 32, 256>}, {transform_indices = @transform_1, window_bounds = array<i64: 2, 2>}, {transform_indices = @transform_2, window_bounds = array<i64: 2, 2, 32>}, {transform_indices = @transform_3, window_bounds = array<i64: 2, 2>}, {transform_indices = @transform_4, window_bounds = array<i64: 2, 2>}]} {
    %c0 = arith.constant 0 : index
    %c0_0 = arith.constant 0 : index
    %c0_1 = arith.constant 0 : index
    %c0_2 = arith.constant 0 : index
    %0 = vector.load %arg1[%c0, %c0_0, %c0_1, %c0_2] : memref<2x2x32x256xf32, #tpu.memory_space<vmem>>, vector<2x1x32x256xf32>
    %1 = vector.shape_cast %0 : vector<2x1x32x256xf32> to vector<2x32x256xf32>
    %cst = arith.constant dense<0.000000e+00> : vector<2x32xf32>
    %2 = vector.multi_reduction <add>, %1, %cst [2] : vector<2x32x256xf32> to vector<2x32xf32>
    %c0_3 = arith.constant 0 : index
    %c0_4 = arith.constant 0 : index
    %c0_5 = arith.constant 0 : index
    %3 = vector.load %arg3[%c0_3, %c0_4, %c0_5] : memref<2x2x32xf32, #tpu.memory_space<vmem>>, vector<2x1x32xf32>
    %4 = vector.shape_cast %3 : vector<2x1x32xf32> to vector<2x32xf32>
    %5 = arith.mulf %2, %4 : vector<2x32xf32>
    %cst_6 = arith.constant dense<0.000000e+00> : vector<2xf32>
    %6 = vector.multi_reduction <add>, %5, %cst_6 [1] : vector<2x32xf32> to vector<2xf32>
    %7 = vector.shape_cast %6 : vector<2xf32> to vector<2x1xf32>
    %c0_7 = arith.constant 0 : index
    %c1 = arith.constant 1 : index
    %c0_8 = arith.constant 0 : index
    %c0_9 = arith.constant 0 : index
    %8 = vector.load %arg1[%c0_7, %c1, %c0_8, %c0_9] : memref<2x2x32x256xf32, #tpu.memory_space<vmem>>, vector<2x1x32x256xf32>
    %9 = vector.shape_cast %8 : vector<2x1x32x256xf32> to vector<2x32x256xf32>
    %cst_10 = arith.constant dense<0.000000e+00> : vector<2x32xf32>
    %10 = vector.multi_reduction <add>, %9, %cst_10 [2] : vector<2x32x256xf32> to vector<2x32xf32>
    %c0_11 = arith.constant 0 : index
    %c1_12 = arith.constant 1 : index
    %c0_13 = arith.constant 0 : index
    %11 = vector.load %arg3[%c0_11, %c1_12, %c0_13] : memref<2x2x32xf32, #tpu.memory_space<vmem>>, vector<2x1x32xf32>
    %12 = vector.shape_cast %11 : vector<2x1x32xf32> to vector<2x32xf32>
    %13 = arith.mulf %10, %12 : vector<2x32xf32>
    %cst_14 = arith.constant dense<0.000000e+00> : vector<2xf32>
    %14 = vector.multi_reduction <add>, %13, %cst_14 [1] : vector<2x32xf32> to vector<2xf32>
    %15 = vector.shape_cast %14 : vector<2xf32> to vector<2x1xf32>
    %16 = tpu.concatenate %7, %15 in 1 : vector<2x1xf32>, vector<2x1xf32> -> vector<2x2xf32>
    %c0_15 = arith.constant 0 : index
    %c0_16 = arith.constant 0 : index
    %17 = vector.load %arg2[%c0_15, %c0_16] : memref<2x2xf32, #tpu.memory_space<vmem>>, vector<2x2xf32>
    %18 = tpu.reciprocal %17 {approx = true} : vector<2x2xf32> -> vector<2x2xf32>
    %19 = arith.mulf %16, %18 : vector<2x2xf32>
    %c0_17 = arith.constant 0 : index
    %c0_18 = arith.constant 0 : index
    %20 = vector.load %arg4[%c0_17, %c0_18] : memref<2x2xf32, #tpu.memory_space<vmem>>, vector<2x2xf32>
    %21 = arith.addf %19, %20 : vector<2x2xf32>
    %cst_19 = arith.constant dense<0xFF800000> : vector<2xf32>
    %22 = vector.multi_reduction <maximumf>, %21, %cst_19 [1] : vector<2x2xf32> to vector<2xf32>
    %23 = vector.shape_cast %22 : vector<2xf32> to vector<2x1xf32>
    %24 = vector.broadcast %23 : vector<2x1xf32> to vector<2x2xf32>
    %25 = arith.subf %21, %24 : vector<2x2xf32>
    %26 = math.exp %25 : vector<2x2xf32>
    %cst_20 = arith.constant dense<0.000000e+00> : vector<2xf32>
    %27 = vector.multi_reduction <add>, %26, %cst_20 [1] : vector<2x2xf32> to vector<2xf32>
    %28 = vector.shape_cast %27 : vector<2xf32> to vector<2x1xf32>
    %29 = vector.broadcast %28 : vector<2x1xf32> to vector<2x2xf32>
    %30 = arith.divf %26, %29 : vector<2x2xf32>
    %cst_21 = arith.constant 3.600000e+02 : f32
    %31 = vector.broadcast %cst_21 : f32 to vector<2x2xf32>
    %32 = arith.mulf %30, %31 : vector<2x2xf32>
    %cst_22 = arith.constant 0.000000e+00 : f32
    %33 = vector.broadcast %cst_22 : f32 to vector<2x2xf32>
    %34 = arith.addf %32, %33 : vector<2x2xf32>
    %c0_23 = arith.constant 0 : index
    %c0_24 = arith.constant 0 : index
    %35 = vector.load %arg5[%c0_23, %c0_24] : memref<2x2xf32, #tpu.memory_space<vmem>>, vector<2x2xf32>
    tpu.vector_store %arg5[%c0_23, %c0_24], %34 {strides = array<i32>} : memref<2x2xf32, #tpu.memory_space<vmem>>, vector<2x2xf32>,
    return
  }
  func.func @transform_0(%arg0: i32) -> (i32, i32, i32, i32) {
    %c0_i32 = arith.constant 0 : i32
    %c0_i32_0 = arith.constant 0 : i32
    %c0_i32_1 = arith.constant 0 : i32
    %c0_i32_2 = arith.constant 0 : i32
    return %arg0, %c0_i32, %c0_i32_0, %c0_i32_1 : i32, i32, i32, i32
  }
  func.func @transform_1(%arg0: i32) -> (i32, i32) {
    %c0_i32 = arith.constant 0 : i32
    %c0_i32_0 = arith.constant 0 : i32
    return %arg0, %c0_i32 : i32, i32
  }
  func.func @transform_2(%arg0: i32) -> (i32, i32, i32) {
    %c0_i32 = arith.constant 0 : i32
    %c0_i32_0 = arith.constant 0 : i32
    %c0_i32_1 = arith.constant 0 : i32
    return %arg0, %c0_i32, %c0_i32_0 : i32, i32, i32
  }
  func.func @transform_3(%arg0: i32) -> (i32, i32) {
    %c0_i32 = arith.constant 0 : i32
    %c0_i32_0 = arith.constant 0 : i32
    return %arg0, %c0_i32 : i32, i32
  }
  func.func @transform_4(%arg0: i32) -> (i32, i32) {
    %c0_i32 = arith.constant 0 : i32
    %c0_i32_0 = arith.constant 0 : i32
    return %arg0, %c0_i32 : i32, i32
  }
}

</mosaic_0001>

<bundles_post_ra>
// kernel: tpu_custom_call.1
= control target key start
LH: loop header
LB: loop body
LE: loop exit
PB: predicated region body
PF: predicated region fallthrough
CT: control target
= control target key end

     0   :  { %9 = vsyncpa [#allocation3], 0  ;;  %s582_s0 = inlined_call_operand.hbm [shape: f32[2,2,32,256], index: 0, kind: input, shape index: {}]   ;;  %s583_s1 = inlined_call_operand.vmem [shape: f32[2,2], index: 1, kind: input, shape index: {}]   ;;  %s584_s2 = inlined_call_operand.vmem [shape: f32[2,2,32], index: 2, kind: input, shape index: {}]   ;;  %s585_s3 = inlined_call_operand.vmem [shape: f32[2,2], index: 3, kind: input, shape index: {}]   ;;  %s586_s4 = inlined_call_operand.hbm [shape: f32[2,2], index: 4, kind: output, shape index: {}]  }
   0x1   :  { %10 = vsyncpa [#allocation4], 0  ;;  %s491_s15 = smov [#allocation2]   ;;  %s443_s19 = scalar_lea.hbm %s582_s0, 4096 }
   0x2   :  { %s16_s16 = sshll.u32 %s491_s15, 4  ;;  %p444_p0 = scmp.ne.s32.totalorder %s582_s0, %s443_s19  ;;  %s17_s16 = int_to_ptr.vmem [resolvable:$true] %s16_s16 }
   0x3   :  { %p447_p1 = scmp.lt.u32.totalorder %s443_s19, %s582_s0 }
   0x5   :  { %p449_p2 = pnand %p447_p1, %p444_p0 }
   0x7   :  { %452 = shalt.err (!%p449_p2)
}
   0x8   :  { %s453_s24 = scalar_lea.vmem %s17_s16, 4096  ;;  %p458_p4 = scmp.lt.s32.totalorder %s17_s16, %s17_s16 }
   0x9   :  { %p454_p3 = scmp.ne.s32.totalorder %s17_s16, %s453_s24  ;;  %p459_p5 = scmp.lt.s32.totalorder %s453_s24, %s453_s24 }
   0xb   :  { %p460_p6 = por %p459_p5, %p458_p4 }
   0xd   :  { %p461_p7 = pnand %p460_p6, %p454_p3 }
   0xf   :  { %464 = shalt.err (!%p461_p7)
}
  0x10   :  { %s492_s25 = smov 256   ;;  %s493_s26 = smov 16  }
  0x11   :  { %22 = dma.hbm_to_vmem [thread:$0]  %s582_s0, 4096, %s17_s16, [#allocation3], %s492_s25, %s492_s25, %s493_s26  }
  0x12   :  { %487 = dma.done.wait [#allocation3], 4096  }
  0x13   :  { %488 = vsyncadd [#allocation3], 4294963200  ;;  %v40_v0 = vld [vmem:[#allocation2 + $0x80] sm:$0xff]  ;;  %v41_v1 = vld [vmem:[#allocation2 + $0x88] sm:$0xff]  ;;  %v494_v50 = vmov 0   ;;  %vm173_vm0 = vcmask 130112  }
  0x14   :  { %v32_v2 = vld [vmem:[#allocation2] sm:$0xff]  ;;  %v60_v3 = vadd.f32 %v41_v1, %v40_v0  ;;  %v33_v4 = vld [vmem:[#allocation2 + $0x8] sm:$0xff]  ;;  %v42_v5 = vld [vmem:[#allocation2 + $0x90] sm:$0xff]  ;;  %436 = vset.pattern.permute.xlu1 %v494_v50  ;;  %435 = vset.pattern.permute.xlu0 %v494_v50  ;;  %vm180_vm1 = vcmask 195712   ;;  %vm187_vm2 = vcmask 261312   ;;  %vm208_vm3 = vcmask 1041409  }
  0x15   :  { %v43_v6 = vld [vmem:[#allocation2 + $0x98] sm:$0xff]  ;;  %v48_v7 = vadd.f32 %v33_v4, %v32_v2  ;;  %v34_v8 = vld [vmem:[#allocation2 + $0x10] sm:$0xff]  ;;  %v216_v14 = vld [vmem:[#allocation2 + $0x40] sm:$0xff]  ;;  %vm211_vm4 = vcmask 254976   ;;  %vm389_vm5 = vcmask 7168   ;;  %vm396_vm6 = vcmask 9216  }
  0x16   :  { %v35_v9 = vld [vmem:[#allocation2 + $0x18] sm:$0xff]  ;;  %61 = vadd.xlane.f32.xlu1 %v60_v3  ;;  %v63_v10 = vadd.f32 %v43_v6, %v42_v5  ;;  %v218_v12 = vld [vmem:[#allocation2 + $0x50] sm:$0xff]  ;;  %v217_v15 = vld [vmem:[#allocation2 + $0x48] sm:$0xff] }
  0x17   :  { %49 = vadd.xlane.f32.xlu0 %v48_v7  ;;  %v51_v11 = vadd.f32 %v35_v9, %v34_v8  ;;  %v219_v13 = vld [vmem:[#allocation2 + $0x58] sm:$0xff]  ;;  %v232_v17 = vadd.f32 %v217_v15, %v216_v14  ;;  %v226_v18 = vld [vmem:[#allocation2 + $0xd0] sm:$0xff]  ;;  %v224_v20 = vld [vmem:[#allocation2 + $0xc0] sm:$0xff] }
  0x18   :  { %v235_v16 = vadd.f32 %v219_v13, %v218_v12  ;;  %v227_v19 = vld [vmem:[#allocation2 + $0xd8] sm:$0xff]  ;;  %v225_v21 = vld [vmem:[#allocation2 + $0xc8] sm:$0xff]  ;;  %v44_v24 = vld [vmem:[#allocation2 + $0xa0] sm:$0xff] }
  0x19   :  { %v247_v22 = vadd.f32 %v227_v19, %v226_v18  ;;  %v244_v23 = vadd.f32 %v225_v21, %v224_v20  ;;  %v45_v25 = vld [vmem:[#allocation2 + $0xa8] sm:$0xff]  ;;  %v36_v26 = vld [vmem:[#allocation2 + $0x20] sm:$0xff]  ;;  %v46_v36 = vld [vmem:[#allocation2 + $0xb0] sm:$0xff] }
  0x1a   :  { %64 = vadd.xlane.f32.xlu1 %v63_v10  ;;  %v37_v27 = vld [vmem:[#allocation2 + $0x28] sm:$0xff]  ;;  %v66_v28 = vadd.f32 %v45_v25, %v44_v24  ;;  %v228_v30 = vld [vmem:[#allocation2 + $0xe0] sm:$0xff]  ;;  %v47_v37 = vld [vmem:[#allocation2 + $0xb8] sm:$0xff] }
  0x1b   :  { %52 = vadd.xlane.f32.xlu0 %v51_v11  ;;  %v54_v29 = vadd.f32 %v37_v27, %v36_v26  ;;  %v229_v31 = vld [vmem:[#allocation2 + $0xe8] sm:$0xff]  ;;  %v220_v32 = vld [vmem:[#allocation2 + $0x60] sm:$0xff]  ;;  %v38_v38 = vld [vmem:[#allocation2 + $0x30] sm:$0xff]  ;;  %v69_v40 = vadd.f32 %v47_v37, %v46_v36 }
  0x1c   :  { %v221_v33 = vld [vmem:[#allocation2 + $0x68] sm:$0xff]  ;;  %v250_v34 = vadd.f32 %v229_v31, %v228_v30  ;;  %v39_v39 = vld [vmem:[#allocation2 + $0x38] sm:$0xff]  ;;  %v230_v42 = vld [vmem:[#allocation2 + $0xf0] sm:$0xff] }
  0x1d   :  { %v238_v35 = vadd.f32 %v221_v33, %v220_v32  ;;  %v57_v41 = vadd.f32 %v39_v39, %v38_v38  ;;  %v231_v43 = vld [vmem:[#allocation2 + $0xf8] sm:$0xff]  ;;  %v222_v44 = vld [vmem:[#allocation2 + $0x70] sm:$0xff]  ;;  %v426_v48 = vld [vmem:[%s584_s2] ss:$0 sm:$0xff] }
  0x1e   :  { %236 = vadd.xlane.f32.xlu1 %v235_v16  ;;  %v223_v45 = vld [vmem:[#allocation2 + $0x78] sm:$0xff]  ;;  %v253_v46 = vadd.f32 %v231_v43, %v230_v42  ;;  %v427_v49 = vld [vmem:[%s584_s2 + $0x2] ss:$0 sm:$0xff]  ;;  %v428_v51 = vld [vmem:[%s584_s2 + $0x1] ss:$0 sm:$0xff] }
  0x1f   :  { %233 = vadd.xlane.f32.xlu0 %v232_v17  ;;  %v241_v47 = vadd.f32 %v223_v45, %v222_v44  ;;  %v429_v52 = vld [vmem:[%s584_s2 + $0x3] ss:$0 sm:$0xff] }
  0x22   :  { %248 = vadd.xlane.f32.xlu1 %v247_v22 }
  0x23   :  { %245 = vadd.xlane.f32.xlu0 %v244_v23 }
  0x26   :  { %67 = vadd.xlane.f32.xlu1 %v66_v28 }
  0x27   :  { %55 = vadd.xlane.f32.xlu0 %v54_v29 }
  0x2a   :  { %251 = vadd.xlane.f32.xlu1 %v250_v34 }
  0x2b   :  { %239 = vadd.xlane.f32.xlu0 %v238_v35 }
  0x2e   :  { %70 = vadd.xlane.f32.xlu1 %v69_v40  ;;  %v162_v40 = vlaneseq }
  0x2f   :  { %58 = vadd.xlane.f32.xlu0 %v57_v41 }
  0x30   :  { %v163_v43 = vand.u32 127, %v162_v40 }
  0x32   :  { %254 = vadd.xlane.f32.xlu1 %v253_v46  ;;  %v165_v46 = vshrl.u32 %v162_v40, 7  ;;  %v175_v50 = vadd.s32 4294967280, %v163_v43 }
  0x33   :  { %242 = vadd.xlane.f32.xlu0 %v241_v47  ;;  %v168_v47 = vadd.s32 4294967288, %v163_v43 }
  0x43   :  { %85 = vbcast.lane.b32.xlu1 %v426_v48, 264 }
  0x47   :  { %100 = vbcast.lane.b32.xlu1 %v427_v49, 256 }
  0x49   :  { %81 = vbcast.lane.b32.xlu0 %v426_v48, 256 }
  0x4b   :  { %104 = vbcast.lane.b32.xlu1 %v427_v49, 264 }
  0x4d   :  { %265 = vbcast.lane.b32.xlu0 %v428_v51, 256 }
  0x4f   :  { %269 = vbcast.lane.b32.xlu1 %v428_v51, 264 }
  0x51   :  { %284 = vbcast.lane.b32.xlu0 %v429_v52, 256 }
  0x53   :  { %288 = vbcast.lane.b32.xlu1 %v429_v52, 264 }
  0x55   :  { %89 = vbcast.lane.b32.xlu0 %v426_v48, 272 }
  0x57   :  { %108 = vbcast.lane.b32.xlu1 %v427_v49, 272 }
  0x59   :  { %273 = vbcast.lane.b32.xlu0 %v428_v51, 272 }
  0x5b   :  { %292 = vbcast.lane.b32.xlu1 %v429_v52, 272 }
  0x5d   :  { %93 = vbcast.lane.b32.xlu0 %v426_v48, 280 }
  0x5f   :  { %112 = vbcast.lane.b32.xlu1 %v427_v49, 280 }
  0x61   :  { %277 = vbcast.lane.b32.xlu0 %v428_v51, 280  ;;  %v182_v51 = vadd.s32 4294967272, %v163_v43 }
  0x63   :  { %296 = vbcast.lane.b32.xlu1 %v429_v52, 280  ;;  %v171_v52 = vsub.s32 %v168_v47, %v165_v46 }
  0xa3   :  { %v62_v53 = vpop.xlane.xlu1 %61 }
  0xa4   :  { %v50_v54 = vpop.xlane.xlu0 %49 }
  0xa7   :  { %v65_v55 = vpop.xlane.xlu1 %64 }
  0xa8   :  { %v53_v56 = vpop.xlane.xlu0 %52 }
  0xab   :  { %v237_v57 = vpop.xlane.xlu1 %236 }
  0xac   :  { %v234_v58 = vpop.xlane.xlu0 %233 }
  0xaf   :  { %v249_v59 = vpop.xlane.xlu1 %248 }
  0xb0   :  { %v246_v60 = vpop.xlane.xlu0 %245 }
  0xb3   :  { %v68_v61 = vpop.xlane.xlu1 %67 }
  0xb4   :  { %v56_v62 = vpop.xlane.xlu0 %55 }
  0xb7   :  { %v252_v63 = vpop.xlane.xlu1 %251 }
  0xb8   :  { %v240_v0 = vpop.xlane.xlu0 %239 }
  0xbb   :  { %v71_v1 = vpop.xlane.xlu1 %70 }
  0xbc   :  { %v59_v2 = vpop.xlane.xlu0 %58 }
  0xbf   :  { %v255_v3 = vpop.xlane.xlu1 %254 }
  0xc0   :  { %v243_v4 = vpop.xlane.xlu0 %242 }
  0xc3   :  { %v86_v5 = vpop.permute.xlu1 %85 }
  0xc4   :  { %v123_v6 = vmul.f32 %v86_v5, %v53_v56  ;;  %v82_v7 = vpop.permute.xlu0 %81  ;;  %v178_v56 = vsub.s32 %v175_v50, %v165_v46 }
  0xc5   :  { %v122_v8 = vmul.f32 %v82_v7, %v50_v54 }
  0xc6   :  { %142 = vperm.xlu1 %436, %v123_v6  }
  0xc7   :  { %139 = vperm.xlu0 %435, %v122_v8   ;;  %v101_v9 = vpop.permute.xlu1 %100 }
  0xc8   :  { %v126_v10 = vmul.f32 %v101_v9, %v62_v53  ;;  %v266_v11 = vpop.permute.xlu0 %265  ;;  %v166_v53 = vsub.s32 %v163_v43, %v165_v46 }
  0xc9   :  { %v306_v13 = vmul.f32 %v266_v11, %v234_v58 }
  0xca   :  { %151 = vperm.xlu1 %436, %v126_v10  }
  0xcb   :  { %v105_v12 = vpop.permute.xlu1 %104 }
  0xcc   :  { %v127_v14 = vmul.f32 %v105_v12, %v65_v55  ;;  %v285_v15 = vpop.permute.xlu0 %284 }
  0xcd   :  { %v310_v17 = vmul.f32 %v285_v15, %v246_v60 }
  0xce   :  { %154 = vperm.xlu0 %435, %v127_v14   ;;  %323 = vperm.xlu1 %436, %v306_v13  }
  0xcf   :  { %v270_v16 = vpop.permute.xlu1 %269 }
  0xd0   :  { %v307_v18 = vmul.f32 %v270_v16, %v237_v57  ;;  %v90_v19 = vpop.permute.xlu0 %89  ;;  %v185_v57 = vsub.s32 %v182_v51, %v165_v46 }
  0xd1   :  { %v124_v21 = vmul.f32 %v90_v19, %v56_v62 }
  0xd2   :  { %326 = vperm.xlu0 %435, %v307_v18   ;;  %335 = vperm.xlu1 %436, %v310_v17  }
  0xd3   :  { %v289_v20 = vpop.permute.xlu1 %288 }
  0xd4   :  { %v311_v22 = vmul.f32 %v289_v20, %v249_v59  ;;  %v274_v23 = vpop.permute.xlu0 %273 }
  0xd5   :  { %v308_v25 = vmul.f32 %v274_v23, %v240_v0 }
  0xd6   :  { %338 = vperm.xlu0 %435, %v311_v22   ;;  %145 = vperm.xlu1 %436, %v124_v21  }
  0xd7   :  { %v109_v24 = vpop.permute.xlu1 %108 }
  0xd8   :  { %v128_v26 = vmul.f32 %v109_v24, %v68_v61  ;;  %v94_v27 = vpop.permute.xlu0 %93 }
  0xd9   :  { %v125_v29 = vmul.f32 %v94_v27, %v59_v2 }
  0xda   :  { %157 = vperm.xlu0 %435, %v128_v26   ;;  %329 = vperm.xlu1 %436, %v308_v25  }
  0xdb   :  { %v293_v28 = vpop.permute.xlu1 %292 }
  0xdc   :  { %v312_v30 = vmul.f32 %v293_v28, %v252_v63  ;;  %v278_v31 = vpop.permute.xlu0 %277 }
  0xdd   :  { %v309_v33 = vmul.f32 %v278_v31, %v243_v4  ;;  %v391_v31 = vld [vmem:[%s583_s1] sm:$0x3]  ;;  %s495_s1 = smov [#allocation5]  }
  0xde   :  { %341 = vperm.xlu0 %435, %v312_v30   ;;  %148 = vperm.xlu1 %436, %v125_v29   ;;  %437 = vrcp.f32 %v391_v31  ;;  %s417_s13 = sshll.u32 %s495_s1, 4  ;;  %s418_s13 = int_to_ptr.vmem [resolvable:$true] %s417_s13 }
  0xdf   :  { %v113_v32 = vpop.permute.xlu1 %112  ;;  %p470_p9 = scmp.lt.s32.totalorder %s418_s13, %s418_s13 }
  0xe0   :  { %v129_v34 = vmul.f32 %v113_v32, %v71_v1 }
  0xe2   :  { %160 = vperm.xlu0 %435, %v129_v34   ;;  %332 = vperm.xlu1 %436, %v309_v33  }
  0xe3   :  { %v297_v35 = vpop.permute.xlu1 %296 }
  0xe4   :  { %v313_v36 = vmul.f32 %v297_v35, %v255_v3 }
  0xe6   :  { %344 = vperm.xlu0 %435, %v313_v36   ;;  %v394_v36 = vld [vmem:[%s585_s3] sm:$0x3]  ;;  %s465_s3 = scalar_lea.vmem %s418_s13, 32 }
  0xe7   :  { %p466_p8 = scmp.ne.s32.totalorder %s418_s13, %s465_s3  ;;  %p471_p10 = scmp.lt.s32.totalorder %s465_s3, %s465_s3 }
  0xe8   :  { %v438_v32 = vpop.eup %437 }
  0xe9   :  { %p472_p11 = por %p471_p10, %p470_p9 }
  0xeb   :  { %p473_p12 = pnand %p472_p11, %p466_p8 }
 0x145   :  { %v143_v37 = vpop.permute.xlu1 %142 }
 0x146   :  { %v140_v38 = vpop.permute.xlu0 %139  ;;  %v172_v58 = vrot.slane %v143_v37, %v171_v52 }
 0x147   :  { %v167_v59 = vrot.slane %v140_v38, %v166_v53 }
 0x149   :  { %v152_v39 = vpop.permute.xlu1 %151  ;;  %v174_v3 = vsel %vm173_vm0, %v172_v58, %v167_v59 }
 0x14a   :  { %v192_v1 = vrot.slane %v152_v39, %v166_v53 }
 0x14d   :  { %v324_v41 = vpop.permute.xlu1 %323  ;;  %v155_v42 = vpop.permute.xlu0 %154 }
 0x14e   :  { %v196_v62 = vrot.slane %v155_v42, %v171_v52  ;;  %v349_v4 = vrot.slane %v324_v41, %v166_v53 }
 0x150   :  { %v197_v7 = vsel %vm173_vm0, %v196_v62, %v192_v1 }
 0x151   :  { %v336_v44 = vpop.permute.xlu1 %335  ;;  %v327_v45 = vpop.permute.xlu0 %326 }
 0x152   :  { %v353_v8 = vrot.slane %v327_v45, %v171_v52  ;;  %v368_v15 = vrot.slane %v336_v44, %v166_v53 }
 0x154   :  { %v354_v21 = vsel %vm173_vm0, %v353_v8, %v349_v4 }
 0x155   :  { %v146_v48 = vpop.permute.xlu1 %145  ;;  %v339_v49 = vpop.permute.xlu0 %338 }
 0x156   :  { %v179_v63 = vrot.slane %v146_v48, %v178_v56  ;;  %v372_v9 = vrot.slane %v339_v49, %v171_v52 }
 0x158   :  { %v181_v11 = vsel %vm180_vm1, %v179_v63, %v174_v3  ;;  %v373_v22 = vsel %vm173_vm0, %v372_v9, %v368_v15 }
 0x159   :  { %v330_v54 = vpop.permute.xlu1 %329  ;;  %v158_v55 = vpop.permute.xlu0 %157 }
 0x15a   :  { %v201_v0 = vrot.slane %v158_v55, %v178_v56  ;;  %v358_v12 = vrot.slane %v330_v54, %v178_v56 }
 0x15c   :  { %v202_v13 = vsel %vm180_vm1, %v201_v0, %v197_v7  ;;  %v359_v25 = vsel %vm180_vm1, %v358_v12, %v354_v21 }
 0x15d   :  { %v149_v60 = vpop.permute.xlu1 %148  ;;  %v342_v61 = vpop.permute.xlu0 %341 }
 0x15e   :  { %v186_v2 = vrot.slane %v149_v60, %v185_v57  ;;  %v377_v14 = vrot.slane %v342_v61, %v178_v56 }
 0x160   :  { %v188_v17 = vsel %vm187_vm2, %v186_v2, %v181_v11  ;;  %v378_v26 = vsel %vm180_vm1, %v377_v14, %v373_v22 }
 0x161   :  { %v333_v5 = vpop.permute.xlu1 %332  ;;  %v161_v6 = vpop.permute.xlu0 %160 }
 0x162   :  { %v206_v10 = vrot.slane %v161_v6, %v185_v57  ;;  %v363_v16 = vrot.slane %v333_v5, %v185_v57 }
 0x164   :  { %v207_v18 = vsel %vm187_vm2, %v206_v10, %v202_v13  ;;  %v364_v27 = vsel %vm187_vm2, %v363_v16, %v359_v25 }
 0x165   :  { %v345_v19 = vpop.permute.xlu0 %344  ;;  %v209_v20 = vsel %vm208_vm3, %v207_v18, %v188_v17 }
 0x166   :  { %v382_v23 = vrot.slane %v345_v19, %v185_v57  ;;  %v212_v24 = vsel %vm211_vm4, %v209_v20, 0.0 }
 0x167   :  { %213 = vadd.xlane.f32.xlu1 %v212_v24 }
 0x168   :  { %v383_v28 = vsel %vm187_vm2, %v382_v23, %v378_v26 }
 0x169   :  { %v384_v29 = vsel %vm208_vm3, %v383_v28, %v364_v27 }
 0x16a   :  { %v386_v30 = vsel %vm211_vm4, %v384_v29, 0.0 }
 0x16b   :  { %387 = vadd.xlane.f32.xlu0 %v386_v30 }
 0x1f4   :  { %v214_v33 = vpop.xlane.xlu1 %213 }
 0x1f8   :  { %v388_v34 = vpop.xlane.xlu0 %387 }
 0x1f9   :  { %v390_v35 = vsel %vm389_vm5, %v214_v33, %v388_v34 }
 0x1fa   :  { %v393_v37 = vmul.f32 %v438_v32, %v390_v35 }
 0x1fc   :  { %v395_v38 = vadd.f32 %v394_v36, %v393_v37 }
 0x1fe   :  { %v397_v39 = vsel %vm396_vm6, %v395_v38, -inf }
 0x1ff   :  { %398 = vmax.xlane.f32.xlu0 %v397_v39 }
 0x28c   :  { %v399_v40 = vpop.xlane.xlu0 %398 }
 0x28d   :  { %v400_v41 = vsub.f32 %v395_v38, %v399_v40 }
 0x28f   :  { %v401_v42 = vmul.f32 1.442695, %v400_v41 }
 0x291   :  { %439 = vpow2.f32 %v401_v42 }
 0x29b   :  { %v440_v43 = vpop.eup %439 }
 0x29c   :  { %v403_v44 = vsel %vm396_vm6, %v440_v43, 0.0 }
 0x29d   :  { %404 = vadd.xlane.f32.xlu0 %v403_v44 }
 0x32a   :  { %v405_v45 = vpop.xlane.xlu0 %404 }
 0x32b   :  { %441 = vrcp.f32 %v405_v45 }
 0x335   :  { %v442_v46 = vpop.eup %441 }
 0x336   :  { %v407_v47 = vmul.f32 %v442_v46, %v440_v43 }
 0x338   :  { %v408_v48 = vmul.f32 360.0, %v407_v47 }
 0x33a   :  { %410 = vst.msk [vmem:[#allocation5] sm:$0x3] %vm396_vm6, %v408_v48 }
 0x33b   :  { %476 = shalt.err (!%p473_p12)
}
 0x33c   :  { %s477_s16 = scalar_lea.hbm %s586_s4, 32 }
 0x33d   :  { %p478_p13 = scmp.ne.s32.totalorder %s586_s4, %s477_s16  ;;  %p481_p0 = scmp.lt.u32.totalorder %s477_s16, %s586_s4 }
 0x33f   :  { %p483_p1 = pnand %p481_p0, %p478_p13 }
 0x341   :  { %486 = shalt.err (!%p483_p1)
}
 0x342   :  { %420 = dma.vmem_to_hbm [thread:$0]  %s418_s13, 32, %s586_s4, [#allocation4]  }
 0x343   :  { %489 = dma.done.wait [#allocation4], 32  }
 0x344   :  { %490 = vsyncadd [#allocation4], 4294967264 }
 0x345   :  { %424 = vsyncpa [#allocation3], 1 }
 0x346   :  { %425 = vsyncpa [#allocation4], 1 }

</bundles_post_ra>
